<compile_context>
chip_gen: v5e
topology: v5e:2x2
jax: 0.10.0
libtpu: 0.0.40
codegen_flags: <defaults>
</compile_context>

<pallas_src>
import functools

import jax
import jax.numpy as jnp
from jax.experimental import pallas as pl
from jax.experimental.pallas import tpu as pltpu


def _round_up(x: int, m: int) -> int:
    return ((x + m - 1) // m) * m


def _cdiv(a: int, b: int) -> int:
    return -(-a // b)


def _residual_linear_block_kernel(x_ref, w1_ref, b1_ref, w2_ref, b2_ref,
                                  o_ref, acc_ref, *, mm_dtype):
    # x_ref: (TM, Dp)   w1_ref: (Dp, TK)   b1_ref: (1, TK)
    # w2_ref: (TK, Dp)  b2_ref: (1, Dp)    o_ref: (TM, Dp)  acc_ref: (TM, Dp) f32
    k = pl.program_id(1)

    @pl.when(k == 0)
    def _():
        acc_ref[...] = jnp.zeros_like(acc_ref)

    x_mm = x_ref[...]
    if x_mm.dtype != mm_dtype:
        x_mm = x_mm.astype(mm_dtype)

    # first linear (hidden column-block k) + bias + ReLU, f32 MXU accumulation
    h = jnp.dot(x_mm, w1_ref[...], preferred_element_type=jnp.float32)
    h = jnp.maximum(h + b1_ref[...], 0.0)

    # second linear: accumulate the partial product of this hidden block
    acc_ref[...] += jnp.dot(h.astype(mm_dtype), w2_ref[...],
                            preferred_element_type=jnp.float32)

    @pl.when(k == pl.num_programs(1) - 1)
    def _():
        y = jnp.maximum(acc_ref[...] + b2_ref[...], 0.0)
        # re-read x from VMEM (cheap) instead of keeping it live across both matmuls
        o_ref[...] = (x_ref[...].astype(jnp.float32) + y).astype(o_ref.dtype)


def _vmem_estimate(tm, dp, tk, n_k, x_itemsize, out_itemsize, w_itemsize):
    w_bufs = 1 if n_k == 1 else 2                    # resident -> Buffered(1)
    est = 0
    est += 2 * tm * dp * x_itemsize                  # x tile, double-buffered
    est += 2 * tm * dp * out_itemsize                # out tile, double-buffered
    est += w_bufs * dp * tk * w_itemsize             # w1 block(s)
    est += w_bufs * tk * dp * w_itemsize             # w2 block(s)
    est += w_bufs * tk * 4 + dp * 4                  # b1 block(s) + b2 (f32)
    est += tm * dp * 4                               # f32 accumulator scratch
    est += tm * tk * 4 + tm * dp * 4                 # h + partial-product intermediates
    est += tm * (dp + tk) * w_itemsize               # mm-dtype casts of x / h
    return est


def _choose_tiles(n, d, x_itemsize, out_itemsize, w_itemsize,
                  block_rows, vmem_budget, min_k_blocks):
    dp = _round_up(d, 128)                           # lane axis: multiple of 128

    # --- hidden (K) axis: resident weights if they fit, otherwise stream ----
    weight_budget = int(0.45 * vmem_budget)
    resident_bytes = 2 * dp * dp * w_itemsize        # w1 + w2, single-buffered
    if resident_bytes <= weight_budget and min_k_blocks <= 1:
        n_k, tk = 1, dp
    else:
        # streamed weight blocks are double-buffered: 2 weights x 2 buffers
        tk_max = max(128, (weight_budget // (4 * dp * w_itemsize)) // 128 * 128)
        n_k = max(min_k_blocks, _cdiv(dp, min(tk_max, dp)))
        tk = _round_up(_cdiv(dp, n_k), 128)
        dp = n_k * tk                                # re-pad so blocks tile exactly

    # --- row (M) axis: biggest tile that fits the VMEM budget ---------------
    tm = min(block_rows, _round_up(n, 8))
    tm = max(8, (tm // 8) * 8)
    while tm > 8 and _vmem_estimate(tm, dp, tk, n_k, x_itemsize,
                                    out_itemsize, w_itemsize) > vmem_budget:
        tm = max(8, ((tm // 2) // 8) * 8)

    # guarantee >=2 row steps so v7x's second TensorCore isn't idle
    if _round_up(n, tm) // tm < 2 and tm > 8:
        tm = max(8, min(tm, _round_up(_cdiv(n, 2), 8)))

    return tm, dp, tk, n_k


def residual_linear_block_forward(
    x: jax.Array,
    w1: jax.Array,
    b1: jax.Array,
    w2: jax.Array,
    b2: jax.Array,
    *,
    block_rows: int = 512,
    matmul_dtype=None,      # e.g. jnp.bfloat16 for bf16-operand / f32-accumulate MXU
    min_k_blocks: int = 1,  # testing knob: force the weight-streaming path
) -> jax.Array:
    """y = x + relu(relu(x @ w1.T + b1) @ w2.T + b2)

    x: (N, D); w1, w2: (D, D) in PyTorch (out, in) layout; b1, b2: (D,)
    """
    n, d = x.shape
    assert w1.shape == (d, d) and w2.shape == (d, d)
    assert b1.shape == (d,) and b2.shape == (d,)

    mm_dtype = jnp.dtype(matmul_dtype) if matmul_dtype is not None else jnp.dtype(x.dtype)
    x_itemsize = jnp.dtype(x.dtype).itemsize
    out_itemsize = x_itemsize
    w_itemsize = mm_dtype.itemsize

    # --- VMEM budget (per-chip capacity, leave headroom) --------------------
    try:
        vmem_cap = int(pltpu.get_tpu_info().vmem_capacity_bytes)
    except Exception:
        vmem_cap = 64 * 1024 * 1024                  # conservative fallback
    vmem_budget = max(24 * 1024 * 1024, vmem_cap - 8 * 1024 * 1024)

    tm, dp, tk, n_k = _choose_tiles(n, d, x_itemsize, out_itemsize, w_itemsize,
                                    block_rows, vmem_budget, min_k_blocks)
    n_pad = _round_up(n, tm)

    # --- lane-dense padding; zero padding keeps the math exact --------------
    xp = jnp.zeros((n_pad, dp), x.dtype).at[:n, :d].set(x)
    # pre-transpose to (in, out) so the kernel computes x @ w directly
    w1t = jnp.zeros((dp, dp), mm_dtype).at[:d, :d].set(w1.T.astype(mm_dtype))
    w2t = jnp.zeros((dp, dp), mm_dtype).at[:d, :d].set(w2.T.astype(mm_dtype))
    b1p = jnp.zeros((1, dp), jnp.float32).at[0, :d].set(b1.astype(jnp.float32))
    b2p = jnp.zeros((1, dp), jnp.float32).at[0, :d].set(b2.astype(jnp.float32))

    est = _vmem_estimate(tm, dp, tk, n_k, x_itemsize, out_itemsize, w_itemsize)
    vmem_limit = int(min(vmem_cap - (2 << 20), max(est + (8 << 20), 32 << 20)))

    grid = (n_pad // tm, n_k)
    resident = (n_k == 1)   # weights/b1 grid-invariant only when not streamed

    def build(single_buffer: bool):
        def spec(shape, index_map, invariant=False):
            if single_buffer and invariant:
                return pl.BlockSpec(shape, index_map, pipeline_mode=pl.Buffered(1))
            return pl.BlockSpec(shape, index_map)

        return pl.pallas_call(
            functools.partial(_residual_linear_block_kernel, mm_dtype=mm_dtype),
            out_shape=jax.ShapeDtypeStruct((n_pad, dp), x.dtype),
            grid_spec=pltpu.PrefetchScalarGridSpec(
                num_scalar_prefetch=0,
                grid=grid,
                in_specs=[
                    spec((tm, dp), lambda i, k: (i, 0)),                      # x row tile
                    spec((dp, tk), lambda i, k: (0, k), invariant=resident),  # w1^T block
                    spec((1, tk), lambda i, k: (0, k), invariant=resident),   # b1 block
                    spec((tk, dp), lambda i, k: (k, 0), invariant=resident),  # w2^T block
                    spec((1, dp), lambda i, k: (0, 0), invariant=True),       # b2
                ],
                out_specs=spec((tm, dp), lambda i, k: (i, 0)),
                scratch_shapes=[pltpu.VMEM((tm, dp), jnp.float32)],           # f32 acc
            ),
            compiler_params=pltpu.CompilerParams(
                dimension_semantics=("parallel", "arbitrary"),
                vmem_limit_bytes=vmem_limit,
            ),
        )

    try:
        out = build(single_buffer=True)(xp, w1t, b1p, w2t, b2p)
    except Exception:
        # fallback if single-buffered (Buffered(1)) specs are rejected
        out = build(single_buffer=False)(xp, w1t, b1p, w2t, b2p)

    return out[:n, :d]


# TODO(synk): nn.Dropout path (use_dropout=True) is not implemented; the
# module's default config uses nn.Identity there, so forward semantics match.

if __name__ == "__main__":
    key = jax.random.PRNGKey(0)
    keys = jax.random.split(key, 10)

    def ref_fn(x, w1, b1, w2, b2):
        h = jnp.maximum(x @ w1.T + b1, 0.0)
        return x + jnp.maximum(h @ w2.T + b2, 0.0)

    # --- primary test: module-sized small shapes (batch=2, in_features=32) --
    N, D = 2, 32
    x = jax.random.normal(keys[0], (N, D), dtype=jnp.float32)
    w1 = jax.random.normal(keys[1], (D, D), dtype=jnp.float32) * 0.1  # (out, in)
    b1 = jax.random.normal(keys[2], (D,), dtype=jnp.float32) * 0.1
    w2 = jax.random.normal(keys[3], (D, D), dtype=jnp.float32) * 0.1
    b2 = jax.random.normal(keys[4], (D,), dtype=jnp.float32) * 0.1

    y = jax.block_until_ready(residual_linear_block_forward(x, w1, b1, w2, b2))
    y_ref = ref_fn(x, w1, b1, w2, b2)
    assert y.shape == x.shape
    assert jnp.allclose(y, y_ref, atol=1e-4, rtol=1e-4), "mismatch vs reference"

    # --- multi row-tile + streamed-weight (k>1 reduction) path --------------
    N2, D2 = 40, 160
    x2 = jax.random.normal(keys[5], (N2, D2), dtype=jnp.float32)
    w3 = jax.random.normal(keys[6], (D2, D2), dtype=jnp.float32) * 0.05
    b3 = jax.random.normal(keys[7], (D2,), dtype=jnp.float32) * 0.05
    w4 = jax.random.normal(keys[8], (D2, D2), dtype=jnp.float32) * 0.05
    b4 = jax.random.normal(keys[9], (D2,), dtype=jnp.float32) * 0.05
    y2 = jax.block_until_ready(
        residual_linear_block_forward(x2, w3, b3, w4, b4,
                                      block_rows=16, min_k_blocks=2))
    y2_ref = ref_fn(x2, w3, b3, w4, b4)
    assert jnp.allclose(y2, y2_ref, atol=5e-3, rtol=5e-3), "streamed path mismatch"

    # --- bf16-operand / f32-accumulate MXU path ------------------------------
    y3 = jax.block_until_ready(
        residual_linear_block_forward(x, w1, b1, w2, b2,
                                      matmul_dtype=jnp.bfloat16))
    assert jnp.allclose(y3, y_ref, atol=5e-2, rtol=5e-2), "bf16 path mismatch"

    print("KERNEL_OK")
</pallas_src>

<mosaic_0001>
module attributes {stable_mosaic.version = 11 : i64} {
  func.func @_residual_linear_block_kernel(%arg0: i32, %arg1: i32, %arg2: memref<8x128xf32, #tpu.memory_space<vmem>>, %arg3: memref<128x128xf32, #tpu.memory_space<vmem>>, %arg4: memref<1x128xf32, #tpu.memory_space<vmem>>, %arg5: memref<128x128xf32, #tpu.memory_space<vmem>>, %arg6: memref<1x128xf32, #tpu.memory_space<vmem>>, %arg7: memref<8x128xf32, #tpu.memory_space<vmem>>, %arg8: memref<8x128xf32, #tpu.memory_space<vmem>>) attributes {dimension_semantics = [#tpu.dimension_semantics<parallel>, #tpu.dimension_semantics<arbitrary>], iteration_bounds = array<i64: 1, 1>, scalar_prefetch = 0 : i64, scratch_operands = 1 : i64, tpu.core_type = #tpu.core_type<tc>, window_params = [{transform_indices = @transform_0, window_bounds = array<i64: 8, 128>}, {pipeline_mode = #tpu.pipeline_mode<synchronous>, transform_indices = @transform_1, window_bounds = array<i64: 128, 128>}, {pipeline_mode = #tpu.pipeline_mode<synchronous>, transform_indices = @transform_2, window_bounds = array<i64: 1, 128>}, {pipeline_mode = #tpu.pipeline_mode<synchronous>, transform_indices = @transform_3, window_bounds = array<i64: 128, 128>}, {pipeline_mode = #tpu.pipeline_mode<synchronous>, transform_indices = @transform_4, window_bounds = array<i64: 1, 128>}, {transform_indices = @transform_5, window_bounds = array<i64: 8, 128>}]} {
    %c0_i32 = arith.constant 0 : i32
    %0 = arith.cmpi eq, %arg1, %c0_i32 : i32
    %1 = arith.extui %0 : i1 to i32
    %c0_i32_0 = arith.constant 0 : i32
    %2 = arith.cmpi ne, %1, %c0_i32_0 : i32
    scf.if %2 {
      %cst_16 = arith.constant 0.000000e+00 : f32
      %19 = vector.broadcast %cst_16 : f32 to vector<8x128xf32>
      %c0_17 = arith.constant 0 : index
      %c0_18 = arith.constant 0 : index
      %20 = vector.load %arg8[%c0_17, %c0_18] : memref<8x128xf32, #tpu.memory_space<vmem>>, vector<8x128xf32>
      tpu.vector_store %arg8[%c0_17, %c0_18], %19 {strides = array<i32>} : memref<8x128xf32, #tpu.memory_space<vmem>>, vector<8x128xf32>,
    } else {
    }
    %c0 = arith.constant 0 : index
    %c0_1 = arith.constant 0 : index
    %3 = vector.load %arg2[%c0, %c0_1] : memref<8x128xf32, #tpu.memory_space<vmem>>, vector<8x128xf32>
    %c0_2 = arith.constant 0 : index
    %c0_3 = arith.constant 0 : index
    %4 = vector.load %arg3[%c0_2, %c0_3] : memref<128x128xf32, #tpu.memory_space<vmem>>, vector<128x128xf32>
    %cst = arith.constant dense<0.000000e+00> : vector<8x128xf32>
    %5 = tpu.matmul %3, %4, %cst {dimension_numbers = #tpu.dot_dimension_numbers<[1], [0], [0], [1], [0, 0, 1, 1], [], []>} : vector<8x128xf32>, vector<128x128xf32>, vector<8x128xf32> -> vector<8x128xf32>
    %c0_4 = arith.constant 0 : index
    %c0_5 = arith.constant 0 : index
    %6 = vector.load %arg4[%c0_4, %c0_5] : memref<1x128xf32, #tpu.memory_space<vmem>>, vector<1x128xf32>
    %7 = vector.broadcast %6 : vector<1x128xf32> to vector<8x128xf32>
    %8 = arith.addf %5, %7 : vector<8x128xf32>
    %cst_6 = arith.constant 0.000000e+00 : f32
    %9 = vector.broadcast %cst_6 : f32 to vector<8x128xf32>
    %10 = arith.maximumf %8, %9 : vector<8x128xf32>
    %c0_7 = arith.constant 0 : index
    %c0_8 = arith.constant 0 : index
    %11 = vector.load %arg8[%c0_7, %c0_8] : memref<8x128xf32, #tpu.memory_space<vmem>>, vector<8x128xf32>
    %c0_9 = arith.constant 0 : index
    %c0_10 = arith.constant 0 : index
    %12 = vector.load %arg5[%c0_9, %c0_10] : memref<128x128xf32, #tpu.memory_space<vmem>>, vector<128x128xf32>
    %cst_11 = arith.constant dense<0.000000e+00> : vector<8x128xf32>
    %13 = tpu.matmul %10, %12, %cst_11 {dimension_numbers = #tpu.dot_dimension_numbers<[1], [0], [0], [1], [0, 0, 1, 1], [], []>} : vector<8x128xf32>, vector<128x128xf32>, vector<8x128xf32> -> vector<8x128xf32>
    %14 = arith.addf %11, %13 : vector<8x128xf32>
    %c0_12 = arith.constant 0 : index
    %c0_13 = arith.constant 0 : index
    %15 = vector.load %arg8[%c0_12, %c0_13] : memref<8x128xf32, #tpu.memory_space<vmem>>, vector<8x128xf32>
    tpu.vector_store %arg8[%c0_12, %c0_13], %14 {strides = array<i32>} : memref<8x128xf32, #tpu.memory_space<vmem>>, vector<8x128xf32>,
    %c0_i32_14 = arith.constant 0 : i32
    %16 = arith.cmpi eq, %arg1, %c0_i32_14 : i32
    %17 = arith.extui %16 : i1 to i32
    %c0_i32_15 = arith.constant 0 : i32
    %18 = arith.cmpi ne, %17, %c0_i32_15 : i32
    scf.if %18 {
      %c0_16 = arith.constant 0 : index
      %c0_17 = arith.constant 0 : index
      %19 = vector.load %arg8[%c0_16, %c0_17] : memref<8x128xf32, #tpu.memory_space<vmem>>, vector<8x128xf32>
      %c0_18 = arith.constant 0 : index
      %c0_19 = arith.constant 0 : index
      %20 = vector.load %arg6[%c0_18, %c0_19] : memref<1x128xf32, #tpu.memory_space<vmem>>, vector<1x128xf32>
      %21 = vector.broadcast %20 : vector<1x128xf32> to vector<8x128xf32>
      %22 = arith.addf %19, %21 : vector<8x128xf32>
      %cst_20 = arith.constant 0.000000e+00 : f32
      %23 = vector.broadcast %cst_20 : f32 to vector<8x128xf32>
      %24 = arith.maximumf %22, %23 : vector<8x128xf32>
      %c0_21 = arith.constant 0 : index
      %c0_22 = arith.constant 0 : index
      %25 = vector.load %arg2[%c0_21, %c0_22] : memref<8x128xf32, #tpu.memory_space<vmem>>, vector<8x128xf32>
      %26 = arith.addf %25, %24 : vector<8x128xf32>
      %c0_23 = arith.constant 0 : index
      %c0_24 = arith.constant 0 : index
      %27 = vector.load %arg7[%c0_23, %c0_24] : memref<8x128xf32, #tpu.memory_space<vmem>>, vector<8x128xf32>
      tpu.vector_store %arg7[%c0_23, %c0_24], %26 {strides = array<i32>} : memref<8x128xf32, #tpu.memory_space<vmem>>, vector<8x128xf32>,
    } else {
    }
    return
  }
  func.func @transform_0(%arg0: i32, %arg1: i32) -> (i32, i32) {
    %c0_i32 = arith.constant 0 : i32
    %c0_i32_0 = arith.constant 0 : i32
    return %arg0, %c0_i32 : i32, i32
  }
  func.func @transform_1(%arg0: i32, %arg1: i32) -> (i32, i32) {
    %c0_i32 = arith.constant 0 : i32
    %c0_i32_0 = arith.constant 0 : i32
    return %c0_i32, %arg1 : i32, i32
  }
  func.func @transform_2(%arg0: i32, %arg1: i32) -> (i32, i32) {
    %c0_i32 = arith.constant 0 : i32
    %c0_i32_0 = arith.constant 0 : i32
    return %c0_i32, %arg1 : i32, i32
  }
  func.func @transform_3(%arg0: i32, %arg1: i32) -> (i32, i32) {
    %c0_i32 = arith.constant 0 : i32
    %c0_i32_0 = arith.constant 0 : i32
    return %arg1, %c0_i32 : i32, i32
  }
  func.func @transform_4(%arg0: i32, %arg1: i32) -> (i32, i32) {
    %c0_i32 = arith.constant 0 : i32
    %c0_i32_0 = arith.constant 0 : i32
    %c0_i32_1 = arith.constant 0 : i32
    return %c0_i32, %c0_i32_0 : i32, i32
  }
  func.func @transform_5(%arg0: i32, %arg1: i32) -> (i32, i32) {
    %c0_i32 = arith.constant 0 : i32
    %c0_i32_0 = arith.constant 0 : i32
    return %arg0, %c0_i32 : i32, i32
  }
}

module attributes {stable_mosaic.version = 11 : i64} {
  func.func @_residual_linear_block_kernel(%arg0: i32, %arg1: i32, %arg2: memref<8x128xf32, #tpu.memory_space<vmem>>, %arg3: memref<128x128xf32, #tpu.memory_space<vmem>>, %arg4: memref<1x128xf32, #tpu.memory_space<vmem>>, %arg5: memref<128x128xf32, #tpu.memory_space<vmem>>, %arg6: memref<1x128xf32, #tpu.memory_space<vmem>>, %arg7: memref<8x128xf32, #tpu.memory_space<vmem>>, %arg8: memref<8x128xf32, #tpu.memory_space<vmem>>) attributes {dimension_semantics = [#tpu.dimension_semantics<parallel>, #tpu.dimension_semantics<arbitrary>], iteration_bounds = array<i64: 1, 1>, scalar_prefetch = 0 : i64, scratch_operands = 1 : i64, tpu.core_type = #tpu.core_type<tc>, window_params = [{transform_indices = @transform_0, window_bounds = array<i64: 8, 128>}, {transform_indices = @transform_1, window_bounds = array<i64: 128, 128>}, {transform_indices = @transform_2, window_bounds = array<i64: 1, 128>}, {transform_indices = @transform_3, window_bounds = array<i64: 128, 128>}, {pipeline_mode = #tpu.pipeline_mode<synchronous>, transform_indices = @transform_4, window_bounds = array<i64: 1, 128>}, {transform_indices = @transform_5, window_bounds = array<i64: 8, 128>}]} {
    %c0_i32 = arith.constant 0 : i32
    %0 = arith.cmpi eq, %arg1, %c0_i32 : i32
    %1 = arith.extui %0 : i1 to i32
    %c0_i32_0 = arith.constant 0 : i32
    %2 = arith.cmpi ne, %1, %c0_i32_0 : i32
    scf.if %2 {
      %cst_16 = arith.constant 0.000000e+00 : f32
      %19 = vector.broadcast %cst_16 : f32 to vector<8x128xf32>
      %c0_17 = arith.constant 0 : index
      %c0_18 = arith.constant 0 : index
      %20 = vector.load %arg8[%c0_17, %c0_18] : memref<8x128xf32, #tpu.memory_space<vmem>>, vector<8x128xf32>
      tpu.vector_store %arg8[%c0_17, %c0_18], %19 {strides = array<i32>} : memref<8x128xf32, #tpu.memory_space<vmem>>, vector<8x128xf32>,
    } else {
    }
    %c0 = arith.constant 0 : index
    %c0_1 = arith.constant 0 : index
    %3 = vector.load %arg2[%c0, %c0_1] : memref<8x128xf32, #tpu.memory_space<vmem>>, vector<8x128xf32>
    %c0_2 = arith.constant 0 : index
    %c0_3 = arith.constant 0 : index
    %4 = vector.load %arg3[%c0_2, %c0_3] : memref<128x128xf32, #tpu.memory_space<vmem>>, vector<128x128xf32>
    %cst = arith.constant dense<0.000000e+00> : vector<8x128xf32>
    %5 = tpu.matmul %3, %4, %cst {dimension_numbers = #tpu.dot_dimension_numbers<[1], [0], [0], [1], [0, 0, 1, 1], [], []>} : vector<8x128xf32>, vector<128x128xf32>, vector<8x128xf32> -> vector<8x128xf32>
    %c0_4 = arith.constant 0 : index
    %c0_5 = arith.constant 0 : index
    %6 = vector.load %arg4[%c0_4, %c0_5] : memref<1x128xf32, #tpu.memory_space<vmem>>, vector<1x128xf32>
    %7 = vector.broadcast %6 : vector<1x128xf32> to vector<8x128xf32>
    %8 = arith.addf %5, %7 : vector<8x128xf32>
    %cst_6 = arith.constant 0.000000e+00 : f32
    %9 = vector.broadcast %cst_6 : f32 to vector<8x128xf32>
    %10 = arith.maximumf %8, %9 : vector<8x128xf32>
    %c0_7 = arith.constant 0 : index
    %c0_8 = arith.constant 0 : index
    %11 = vector.load %arg8[%c0_7, %c0_8] : memref<8x128xf32, #tpu.memory_space<vmem>>, vector<8x128xf32>
    %c0_9 = arith.constant 0 : index
    %c0_10 = arith.constant 0 : index
    %12 = vector.load %arg5[%c0_9, %c0_10] : memref<128x128xf32, #tpu.memory_space<vmem>>, vector<128x128xf32>
    %cst_11 = arith.constant dense<0.000000e+00> : vector<8x128xf32>
    %13 = tpu.matmul %10, %12, %cst_11 {dimension_numbers = #tpu.dot_dimension_numbers<[1], [0], [0], [1], [0, 0, 1, 1], [], []>} : vector<8x128xf32>, vector<128x128xf32>, vector<8x128xf32> -> vector<8x128xf32>
    %14 = arith.addf %11, %13 : vector<8x128xf32>
    %c0_12 = arith.constant 0 : index
    %c0_13 = arith.constant 0 : index
    %15 = vector.load %arg8[%c0_12, %c0_13] : memref<8x128xf32, #tpu.memory_space<vmem>>, vector<8x128xf32>
    tpu.vector_store %arg8[%c0_12, %c0_13], %14 {strides = array<i32>} : memref<8x128xf32, #tpu.memory_space<vmem>>, vector<8x128xf32>,
    %c0_i32_14 = arith.constant 0 : i32
    %16 = arith.cmpi eq, %arg1, %c0_i32_14 : i32
    %17 = arith.extui %16 : i1 to i32
    %c0_i32_15 = arith.constant 0 : i32
    %18 = arith.cmpi ne, %17, %c0_i32_15 : i32
    scf.if %18 {
      %c0_16 = arith.constant 0 : index
      %c0_17 = arith.constant 0 : index
      %19 = vector.load %arg8[%c0_16, %c0_17] : memref<8x128xf32, #tpu.memory_space<vmem>>, vector<8x128xf32>
      %c0_18 = arith.constant 0 : index
      %c0_19 = arith.constant 0 : index
      %20 = vector.load %arg6[%c0_18, %c0_19] : memref<1x128xf32, #tpu.memory_space<vmem>>, vector<1x128xf32>
      %21 = vector.broadcast %20 : vector<1x128xf32> to vector<8x128xf32>
      %22 = arith.addf %19, %21 : vector<8x128xf32>
      %cst_20 = arith.constant 0.000000e+00 : f32
      %23 = vector.broadcast %cst_20 : f32 to vector<8x128xf32>
      %24 = arith.maximumf %22, %23 : vector<8x128xf32>
      %c0_21 = arith.constant 0 : index
      %c0_22 = arith.constant 0 : index
      %25 = vector.load %arg2[%c0_21, %c0_22] : memref<8x128xf32, #tpu.memory_space<vmem>>, vector<8x128xf32>
      %26 = arith.addf %25, %24 : vector<8x128xf32>
      %c0_23 = arith.constant 0 : index
      %c0_24 = arith.constant 0 : index
      %27 = vector.load %arg7[%c0_23, %c0_24] : memref<8x128xf32, #tpu.memory_space<vmem>>, vector<8x128xf32>
      tpu.vector_store %arg7[%c0_23, %c0_24], %26 {strides = array<i32>} : memref<8x128xf32, #tpu.memory_space<vmem>>, vector<8x128xf32>,
    } else {
    }
    return
  }
  func.func @transform_0(%arg0: i32, %arg1: i32) -> (i32, i32) {
    %c0_i32 = arith.constant 0 : i32
    %c0_i32_0 = arith.constant 0 : i32
    return %arg0, %c0_i32 : i32, i32
  }
  func.func @transform_1(%arg0: i32, %arg1: i32) -> (i32, i32) {
    %c0_i32 = arith.constant 0 : i32
    %c0_i32_0 = arith.constant 0 : i32
    return %c0_i32, %arg1 : i32, i32
  }
  func.func @transform_2(%arg0: i32, %arg1: i32) -> (i32, i32) {
    %c0_i32 = arith.constant 0 : i32
    %c0_i32_0 = arith.constant 0 : i32
    return %c0_i32, %arg1 : i32, i32
  }
  func.func @transform_3(%arg0: i32, %arg1: i32) -> (i32, i32) {
    %c0_i32 = arith.constant 0 : i32
    %c0_i32_0 = arith.constant 0 : i32
    return %arg1, %c0_i32 : i32, i32
  }
  func.func @transform_4(%arg0: i32, %arg1: i32) -> (i32, i32) {
    %c0_i32 = arith.constant 0 : i32
    %c0_i32_0 = arith.constant 0 : i32
    %c0_i32_1 = arith.constant 0 : i32
    return %c0_i32, %c0_i32_0 : i32, i32
  }
  func.func @transform_5(%arg0: i32, %arg1: i32) -> (i32, i32) {
    %c0_i32 = arith.constant 0 : i32
    %c0_i32_0 = arith.constant 0 : i32
    return %arg0, %c0_i32 : i32, i32
  }
}

</mosaic_0001>

<bundles_post_ra>
// kernel: tpu_custom_call.1
= control target key start
LH: loop header
LB: loop body
LE: loop exit
PB: predicated region body
PF: predicated region fallthrough
CT: control target
= control target key end

     0   :  { %10 = vsyncpa [#allocation4], 0  ;;  %s347_s0 = inlined_call_operand.hbm [shape: f32[8,128], index: 0, kind: input, shape index: {}]   ;;  %s348_s1 = inlined_call_operand.hbm [shape: f32[128,128], index: 1, kind: input, shape index: {}]   ;;  %s349_s2 = inlined_call_operand.vmem [shape: f32[1,128], index: 2, kind: input, shape index: {}]   ;;  %s350_s3 = inlined_call_operand.hbm [shape: f32[128,128], index: 3, kind: input, shape index: {}]   ;;  %s351_s4 = inlined_call_operand.vmem [shape: f32[1,128], index: 4, kind: input, shape index: {}]   ;;  %s352_s5 = inlined_call_operand.hbm [shape: f32[8,128], index: 5, kind: output, shape index: {}]  }
   0x1   :  { %11 = vsyncpa [#allocation7], 0  ;;  %s28_s20 = sshll.u32 %s348_s1, 4  ;;  %s29_s20 = int_to_ptr.hbm [resolvable:$true] %s28_s20 }
   0x2   :  { %12 = vsyncpa [#allocation5], 0  ;;  %s293_s21 = smov [#allocation6]   ;;  %s18_s25 = sshll.u32 %s347_s0, 4  ;;  %s19_s25 = int_to_ptr.hbm [resolvable:$true] %s18_s25 }
   0x3   :  { %s30_s22 = sshll.u32 %s293_s21, 4  ;;  %s294_s26 = smov 128   ;;  %s31_s22 = int_to_ptr.vmem [resolvable:$true] %s30_s22 }
   0x4   :  { %s295_s27 = smov 8   ;;  %s296_s28 = smov [#allocation3]  }
   0x5   :  { %36 = dma.hbm_to_vmem [thread:$0]  %s29_s20, 2048, %s31_s22, [#allocation7], %s294_s26, %s294_s26, %s295_s27  }
   0x6   :  { %s20_s29 = sshll.u32 %s296_s28, 4  ;;  %s43_s7 = sshll.u32 %s350_s3, 4  ;;  %s21_s29 = int_to_ptr.vmem [resolvable:$true] %s20_s29  ;;  %s44_s7 = int_to_ptr.hbm [resolvable:$true] %s43_s7 }
   0x7   :  { %23 = dma.hbm_to_vmem [thread:$0]  %s19_s25, 128, %s21_s29, [#allocation4]  }
   0x8   :  { %s297_s1 = smov [#allocation8]  }
   0x9   :  { %s45_s8 = sshll.u32 %s297_s1, 4  ;;  %s46_s8 = int_to_ptr.vmem [resolvable:$true] %s45_s8 }
   0xa   :  { %51 = dma.hbm_to_vmem [thread:$0]  %s44_s7, 2048, %s46_s8, [#allocation7], %s294_s26, %s294_s26, %s295_s27  }
   0xb   :  { %287 = dma.done.wait [#allocation4], 128  }
   0xc   :  { %288 = vsyncadd [#allocation4], 4294967168 }
   0xd   :  { %289 = dma.done.wait [#allocation7], 4096  }
   0xe   :  { %290 = vsyncadd [#allocation7], 4294963200  ;;  %v87_v0 = vld [vmem:[#allocation6 + $0x78] sm:$0xff]  ;;  %v86_v1 = vld [vmem:[#allocation6 + $0x70] sm:$0xff]  ;;  %s298_s11 = smov [#allocation9]   ;;  %s172_s15 = sshll.u32 %s352_s5, 4  ;;  %s173_s15 = int_to_ptr.hbm [resolvable:$true] %s172_s15 }
   0xf   :  { %92 = vmatpush.msra.mxu0 %v87_v0  ;;  %v85_v2 = vld [vmem:[#allocation6 + $0x68] sm:$0xff]  ;;  %v84_v3 = vld [vmem:[#allocation6 + $0x60] sm:$0xff]  ;;  %v129_v4 = vld [vmem:[#allocation8 + $0x78] sm:$0xff]  ;;  %s170_s12 = sshll.u32 %s298_s11, 4  ;;  %s171_s12 = int_to_ptr.vmem [resolvable:$true] %s170_s12 }
  0x10   :  { %v83_v5 = vld [vmem:[#allocation6 + $0x58] sm:$0xff]  ;;  %130 = vmatpush.msra.mxu1 %v129_v4  ;;  %v128_v6 = vld [vmem:[#allocation8 + $0x70] sm:$0xff]  ;;  %v127_v7 = vld [vmem:[#allocation8 + $0x68] sm:$0xff] }
  0x11   :  { %93 = vmatpush.msra.mxu0 %v86_v1  ;;  %v82_v8 = vld [vmem:[#allocation6 + $0x50] sm:$0xff]  ;;  %v126_v9 = vld [vmem:[#allocation8 + $0x60] sm:$0xff]  ;;  %v81_v10 = vld [vmem:[#allocation6 + $0x48] sm:$0xff] }
  0x12   :  { %131 = vmatpush.msra.mxu1 %v128_v6  ;;  %v125_v11 = vld [vmem:[#allocation8 + $0x58] sm:$0xff]  ;;  %v80_v12 = vld [vmem:[#allocation6 + $0x40] sm:$0xff]  ;;  %v124_v13 = vld [vmem:[#allocation8 + $0x50] sm:$0xff] }
  0x13   :  { %94 = vmatpush.msra.mxu0 %v85_v2  ;;  %v79_v14 = vld [vmem:[#allocation6 + $0x38] sm:$0xff]  ;;  %v123_v15 = vld [vmem:[#allocation8 + $0x48] sm:$0xff]  ;;  %v78_v16 = vld [vmem:[#allocation6 + $0x30] sm:$0xff] }
  0x14   :  { %132 = vmatpush.msra.mxu1 %v127_v7  ;;  %v122_v17 = vld [vmem:[#allocation8 + $0x40] sm:$0xff]  ;;  %v77_v18 = vld [vmem:[#allocation6 + $0x28] sm:$0xff]  ;;  %v121_v19 = vld [vmem:[#allocation8 + $0x38] sm:$0xff] }
  0x15   :  { %95 = vmatpush.msra.mxu0 %v84_v3  ;;  %v76_v20 = vld [vmem:[#allocation6 + $0x20] sm:$0xff]  ;;  %v120_v21 = vld [vmem:[#allocation8 + $0x30] sm:$0xff]  ;;  %v75_v22 = vld [vmem:[#allocation6 + $0x18] sm:$0xff] }
  0x16   :  { %133 = vmatpush.msra.mxu1 %v126_v9  ;;  %v119_v23 = vld [vmem:[#allocation8 + $0x28] sm:$0xff]  ;;  %v74_v24 = vld [vmem:[#allocation6 + $0x10] sm:$0xff]  ;;  %v118_v25 = vld [vmem:[#allocation8 + $0x20] sm:$0xff] }
  0x17   :  { %96 = vmatpush.msra.mxu0 %v83_v5  ;;  %v73_v26 = vld [vmem:[#allocation6 + $0x8] sm:$0xff]  ;;  %v117_v27 = vld [vmem:[#allocation8 + $0x18] sm:$0xff]  ;;  %v72_v28 = vld [vmem:[#allocation6] sm:$0xff] }
  0x18   :  { %134 = vmatpush.msra.mxu1 %v125_v11  ;;  %v71_v29 = vld [vmem:[#allocation3] sm:$0xff]  ;;  %v116_v30 = vld [vmem:[#allocation8 + $0x10] sm:$0xff]  ;;  %v115_v31 = vld [vmem:[#allocation8 + $0x8] sm:$0xff] }
  0x19   :  { %97 = vmatpush.msra.mxu0 %v82_v8  ;;  %v114_v32 = vld [vmem:[#allocation8] sm:$0xff]  ;;  %v189_v33 = vld [vmem:[%s349_s2] ss:$0 sm:$0xff] }
  0x1a   :  { %135 = vmatpush.msra.mxu1 %v124_v13  ;;  %v190_v37 = vld [vmem:[%s351_s4] ss:$0 sm:$0xff] }
  0x1b   :  { %98 = vmatpush.msra.mxu0 %v81_v10 }
  0x1c   :  { %136 = vmatpush.msra.mxu1 %v123_v15 }
  0x1d   :  { %99 = vmatpush.msra.mxu0 %v80_v12 }
  0x1e   :  { %137 = vmatpush.msra.mxu1 %v122_v17 }
  0x1f   :  { %100 = vmatpush.msra.mxu0 %v79_v14 }
  0x20   :  { %138 = vmatpush.msra.mxu1 %v121_v19 }
  0x21   :  { %101 = vmatpush.msra.mxu0 %v78_v16 }
  0x22   :  { %139 = vmatpush.msra.mxu1 %v120_v21 }
  0x23   :  { %102 = vmatpush.msra.mxu0 %v77_v18 }
  0x24   :  { %140 = vmatpush.msra.mxu1 %v119_v23 }
  0x25   :  { %103 = vmatpush.msra.mxu0 %v76_v20 }
  0x26   :  { %141 = vmatpush.msra.mxu1 %v118_v25 }
  0x27   :  { %104 = vmatpush.msra.mxu0 %v75_v22 }
  0x28   :  { %142 = vmatpush.msra.mxu1 %v117_v27 }
  0x29   :  { %105 = vmatpush.msra.mxu0 %v74_v24 }
  0x2a   :  { %143 = vmatpush.msra.mxu1 %v116_v30 }
  0x2b   :  { %106 = vmatpush.msra.mxu0 %v73_v26 }
  0x2c   :  { %144 = vmatpush.msra.mxu1 %v115_v31 }
  0x2d   :  { %107 = vmatpush.msra.mxu0 %v72_v28 }
  0x2e   :  { %108 = vmatmul.f32.vlgmr.msra.gmra.mxu0 %v71_v29  ;;  %145 = vmatpush.msra.mxu1 %v114_v32 }
  0xab   :  { %v109_v34 = vpop.f32.mrf.mxu0 }
  0xac   :  { %v110_v35 = vadd.f32 %v189_v33, %v109_v34 }
  0xae   :  { %v112_v36 = vmax.f32 %v110_v35, 0.0 }
  0xb0   :  { %146 = vmatmul.f32.vlgmr.msra.gmra.mxu1 %v112_v36 }
 0x12d   :  { %v147_v38 = vpop.f32.mrf.mxu1 }
 0x12e   :  { %v160_v39 = vadd.f32 %v190_v37, %v147_v38 }
 0x130   :  { %v161_v40 = vmax.f32 %v160_v39, 0.0 }
 0x132   :  { %v163_v41 = vadd.f32 %v161_v40, %v71_v29 }
 0x134   :  { %164 = vst [vmem:[#allocation9] sm:$0xff] %v163_v41 }
 0x135   :  { %175 = dma.vmem_to_hbm [thread:$0]  %s171_s12, 128, %s173_s15, [#allocation5]  }
 0x136   :  { %291 = dma.done.wait [#allocation5], 128  }
 0x137   :  { %292 = vsyncadd [#allocation5], 4294967168 }
 0x138   :  { %180 = vsyncpa [#allocation4], 1 }
 0x139   :  { %181 = vsyncpa [#allocation7], 1 }
 0x13a   :  { %182 = vsyncpa [#allocation5], 1 }

// kernel: tpu_custom_call.1
= control target key start
LH: loop header
LB: loop body
LE: loop exit
PB: predicated region body
PF: predicated region fallthrough
CT: control target
= control target key end

     0   :  { %10 = vsyncpa [#allocation4], 0  ;;  %s347_s0 = inlined_call_operand.hbm [shape: f32[8,128], index: 0, kind: input, shape index: {}]   ;;  %s348_s1 = inlined_call_operand.hbm [shape: f32[128,128], index: 1, kind: input, shape index: {}]   ;;  %s349_s2 = inlined_call_operand.vmem [shape: f32[1,128], index: 2, kind: input, shape index: {}]   ;;  %s350_s3 = inlined_call_operand.hbm [shape: f32[128,128], index: 3, kind: input, shape index: {}]   ;;  %s351_s4 = inlined_call_operand.vmem [shape: f32[1,128], index: 4, kind: input, shape index: {}]   ;;  %s352_s5 = inlined_call_operand.hbm [shape: f32[8,128], index: 5, kind: output, shape index: {}]  }
   0x1   :  { %11 = vsyncpa [#allocation7], 0  ;;  %s28_s20 = sshll.u32 %s348_s1, 4  ;;  %s29_s20 = int_to_ptr.hbm [resolvable:$true] %s28_s20 }
   0x2   :  { %12 = vsyncpa [#allocation5], 0  ;;  %s293_s21 = smov [#allocation6]   ;;  %s18_s25 = sshll.u32 %s347_s0, 4  ;;  %s19_s25 = int_to_ptr.hbm [resolvable:$true] %s18_s25 }
   0x3   :  { %s30_s22 = sshll.u32 %s293_s21, 4  ;;  %s294_s26 = smov 128   ;;  %s31_s22 = int_to_ptr.vmem [resolvable:$true] %s30_s22 }
   0x4   :  { %s295_s27 = smov 8   ;;  %s296_s28 = smov [#allocation3]  }
   0x5   :  { %36 = dma.hbm_to_vmem [thread:$0]  %s29_s20, 2048, %s31_s22, [#allocation7], %s294_s26, %s294_s26, %s295_s27  }
   0x6   :  { %s20_s29 = sshll.u32 %s296_s28, 4  ;;  %s43_s7 = sshll.u32 %s350_s3, 4  ;;  %s21_s29 = int_to_ptr.vmem [resolvable:$true] %s20_s29  ;;  %s44_s7 = int_to_ptr.hbm [resolvable:$true] %s43_s7 }
   0x7   :  { %23 = dma.hbm_to_vmem [thread:$0]  %s19_s25, 128, %s21_s29, [#allocation4]  }
   0x8   :  { %s297_s1 = smov [#allocation8]  }
   0x9   :  { %s45_s8 = sshll.u32 %s297_s1, 4  ;;  %s46_s8 = int_to_ptr.vmem [resolvable:$true] %s45_s8 }
   0xa   :  { %51 = dma.hbm_to_vmem [thread:$0]  %s44_s7, 2048, %s46_s8, [#allocation7], %s294_s26, %s294_s26, %s295_s27  }
   0xb   :  { %287 = dma.done.wait [#allocation4], 128  }
   0xc   :  { %288 = vsyncadd [#allocation4], 4294967168 }
   0xd   :  { %289 = dma.done.wait [#allocation7], 4096  }
   0xe   :  { %290 = vsyncadd [#allocation7], 4294963200  ;;  %v87_v0 = vld [vmem:[#allocation6 + $0x78] sm:$0xff]  ;;  %v86_v1 = vld [vmem:[#allocation6 + $0x70] sm:$0xff]  ;;  %s298_s11 = smov [#allocation9]   ;;  %s172_s15 = sshll.u32 %s352_s5, 4  ;;  %s173_s15 = int_to_ptr.hbm [resolvable:$true] %s172_s15 }
   0xf   :  { %92 = vmatpush.msra.mxu0 %v87_v0  ;;  %v85_v2 = vld [vmem:[#allocation6 + $0x68] sm:$0xff]  ;;  %v84_v3 = vld [vmem:[#allocation6 + $0x60] sm:$0xff]  ;;  %v129_v4 = vld [vmem:[#allocation8 + $0x78] sm:$0xff]  ;;  %s170_s12 = sshll.u32 %s298_s11, 4  ;;  %s171_s12 = int_to_ptr.vmem [resolvable:$true] %s170_s12 }
  0x10   :  { %v83_v5 = vld [vmem:[#allocation6 + $0x58] sm:$0xff]  ;;  %130 = vmatpush.msra.mxu1 %v129_v4  ;;  %v128_v6 = vld [vmem:[#allocation8 + $0x70] sm:$0xff]  ;;  %v127_v7 = vld [vmem:[#allocation8 + $0x68] sm:$0xff] }
  0x11   :  { %93 = vmatpush.msra.mxu0 %v86_v1  ;;  %v82_v8 = vld [vmem:[#allocation6 + $0x50] sm:$0xff]  ;;  %v126_v9 = vld [vmem:[#allocation8 + $0x60] sm:$0xff]  ;;  %v81_v10 = vld [vmem:[#allocation6 + $0x48] sm:$0xff] }
  0x12   :  { %131 = vmatpush.msra.mxu1 %v128_v6  ;;  %v125_v11 = vld [vmem:[#allocation8 + $0x58] sm:$0xff]  ;;  %v80_v12 = vld [vmem:[#allocation6 + $0x40] sm:$0xff]  ;;  %v124_v13 = vld [vmem:[#allocation8 + $0x50] sm:$0xff] }
  0x13   :  { %94 = vmatpush.msra.mxu0 %v85_v2  ;;  %v79_v14 = vld [vmem:[#allocation6 + $0x38] sm:$0xff]  ;;  %v123_v15 = vld [vmem:[#allocation8 + $0x48] sm:$0xff]  ;;  %v78_v16 = vld [vmem:[#allocation6 + $0x30] sm:$0xff] }
  0x14   :  { %132 = vmatpush.msra.mxu1 %v127_v7  ;;  %v122_v17 = vld [vmem:[#allocation8 + $0x40] sm:$0xff]  ;;  %v77_v18 = vld [vmem:[#allocation6 + $0x28] sm:$0xff]  ;;  %v121_v19 = vld [vmem:[#allocation8 + $0x38] sm:$0xff] }
  0x15   :  { %95 = vmatpush.msra.mxu0 %v84_v3  ;;  %v76_v20 = vld [vmem:[#allocation6 + $0x20] sm:$0xff]  ;;  %v120_v21 = vld [vmem:[#allocation8 + $0x30] sm:$0xff]  ;;  %v75_v22 = vld [vmem:[#allocation6 + $0x18] sm:$0xff] }
  0x16   :  { %133 = vmatpush.msra.mxu1 %v126_v9  ;;  %v119_v23 = vld [vmem:[#allocation8 + $0x28] sm:$0xff]  ;;  %v74_v24 = vld [vmem:[#allocation6 + $0x10] sm:$0xff]  ;;  %v118_v25 = vld [vmem:[#allocation8 + $0x20] sm:$0xff] }
  0x17   :  { %96 = vmatpush.msra.mxu0 %v83_v5  ;;  %v73_v26 = vld [vmem:[#allocation6 + $0x8] sm:$0xff]  ;;  %v117_v27 = vld [vmem:[#allocation8 + $0x18] sm:$0xff]  ;;  %v72_v28 = vld [vmem:[#allocation6] sm:$0xff] }
  0x18   :  { %134 = vmatpush.msra.mxu1 %v125_v11  ;;  %v71_v29 = vld [vmem:[#allocation3] sm:$0xff]  ;;  %v116_v30 = vld [vmem:[#allocation8 + $0x10] sm:$0xff]  ;;  %v115_v31 = vld [vmem:[#allocation8 + $0x8] sm:$0xff] }
  0x19   :  { %97 = vmatpush.msra.mxu0 %v82_v8  ;;  %v114_v32 = vld [vmem:[#allocation8] sm:$0xff]  ;;  %v189_v33 = vld [vmem:[%s349_s2] ss:$0 sm:$0xff] }
  0x1a   :  { %135 = vmatpush.msra.mxu1 %v124_v13  ;;  %v190_v37 = vld [vmem:[%s351_s4] ss:$0 sm:$0xff] }
  0x1b   :  { %98 = vmatpush.msra.mxu0 %v81_v10 }
  0x1c   :  { %136 = vmatpush.msra.mxu1 %v123_v15 }
  0x1d   :  { %99 = vmatpush.msra.mxu0 %v80_v12 }
  0x1e   :  { %137 = vmatpush.msra.mxu1 %v122_v17 }
  0x1f   :  { %100 = vmatpush.msra.mxu0 %v79_v14 }
  0x20   :  { %138 = vmatpush.msra.mxu1 %v121_v19 }
  0x21   :  { %101 = vmatpush.msra.mxu0 %v78_v16 }
  0x22   :  { %139 = vmatpush.msra.mxu1 %v120_v21 }
  0x23   :  { %102 = vmatpush.msra.mxu0 %v77_v18 }
  0x24   :  { %140 = vmatpush.msra.mxu1 %v119_v23 }
  0x25   :  { %103 = vmatpush.msra.mxu0 %v76_v20 }
  0x26   :  { %141 = vmatpush.msra.mxu1 %v118_v25 }
  0x27   :  { %104 = vmatpush.msra.mxu0 %v75_v22 }
  0x28   :  { %142 = vmatpush.msra.mxu1 %v117_v27 }
  0x29   :  { %105 = vmatpush.msra.mxu0 %v74_v24 }
  0x2a   :  { %143 = vmatpush.msra.mxu1 %v116_v30 }
  0x2b   :  { %106 = vmatpush.msra.mxu0 %v73_v26 }
  0x2c   :  { %144 = vmatpush.msra.mxu1 %v115_v31 }
  0x2d   :  { %107 = vmatpush.msra.mxu0 %v72_v28 }
  0x2e   :  { %108 = vmatmul.f32.vlgmr.msra.gmra.mxu0 %v71_v29  ;;  %145 = vmatpush.msra.mxu1 %v114_v32 }
  0xab   :  { %v109_v34 = vpop.f32.mrf.mxu0 }
  0xac   :  { %v110_v35 = vadd.f32 %v189_v33, %v109_v34 }
  0xae   :  { %v112_v36 = vmax.f32 %v110_v35, 0.0 }
  0xb0   :  { %146 = vmatmul.f32.vlgmr.msra.gmra.mxu1 %v112_v36 }
 0x12d   :  { %v147_v38 = vpop.f32.mrf.mxu1 }
 0x12e   :  { %v160_v39 = vadd.f32 %v190_v37, %v147_v38 }
 0x130   :  { %v161_v40 = vmax.f32 %v160_v39, 0.0 }
 0x132   :  { %v163_v41 = vadd.f32 %v161_v40, %v71_v29 }
 0x134   :  { %164 = vst [vmem:[#allocation9] sm:$0xff] %v163_v41 }
 0x135   :  { %175 = dma.vmem_to_hbm [thread:$0]  %s171_s12, 128, %s173_s15, [#allocation5]  }
 0x136   :  { %291 = dma.done.wait [#allocation5], 128  }
 0x137   :  { %292 = vsyncadd [#allocation5], 4294967168 }
 0x138   :  { %180 = vsyncpa [#allocation4], 1 }
 0x139   :  { %181 = vsyncpa [#allocation7], 1 }
 0x13a   :  { %182 = vsyncpa [#allocation5], 1 }

</bundles_post_ra>
